<compile_context>
chip_gen: v5e
topology: v5e:2x2
jax: 0.10.0
libtpu: 0.0.40
codegen_flags: <defaults>
</compile_context>

<pallas_src>
import functools

import jax
import jax.numpy as jnp
from jax.experimental import pallas as pl
from jax.experimental.pallas import tpu as pltpu


def _round_up(x, m):
    return (x + m - 1) // m * m


def _vmem_capacity_bytes():
    """Physical VMEM per TensorCore; conservative fallback if the query fails."""
    try:
        cap = getattr(pltpu.get_tpu_info(), "vmem_capacity_bytes", None)
        if cap:
            return int(cap)
    except Exception:
        pass
    return 64 * 1024 * 1024  # v7x physical VMEM -- safe lower bound across gens


def _num_tensorcores():
    """TensorCores sharing this device's grid (best effort; perf hint only)."""
    try:
        dev = jax.devices()[0]
        nc = getattr(dev, "num_cores", None)
        if nc:
            return int(nc)
        kind = str(getattr(dev, "device_kind", "")).lower()
        if "lite" in kind or "v5e" in kind or "v6" in kind:
            return 1                       # single-TC chips
        if "v7" in kind or "v5p" in kind or "v4" in kind:
            return 2                       # 2 TCs (megacore / v7x) share the grid
    except Exception:
        pass
    return 1


def _divisors_up_to(n, limit):
    divs, d = set(), 1
    while d * d <= n:
        if n % d == 0:
            divs.add(d)
            divs.add(n // d)
        d += 1
    return sorted(x for x in divs if 1 <= x <= limit)


def _choose_batch_tile(B, max_tb, prefer_even_steps):
    """Largest divisor of B that fits VMEM; on 2-TC chips prefer an even step count."""
    limit = max(1, min(max_tb, B))
    divs = _divisors_up_to(B, limit) or [1]
    best = divs[-1]
    if prefer_even_steps and B >= 2:
        even = [d for d in divs if (B // d) % 2 == 0]
        if even and even[-1] * 2 >= best:   # never sacrifice >2x tile size for it
            best = even[-1]
    return best


def _attention_gate_kernel(x_ref, w1t_ref, b1_ref, w2t_ref, b2_ref, o_ref, *, inv_hw):
    # x_ref / o_ref: (TB, C, HW) block in the input dtype (f32 or bf16).
    x = x_ref[...]

    # AdaptiveAvgPool2d((1, 1)): lane reduction with f32 accumulation; divide by
    # the true H*W (closed-over Python constant; padded lanes never enter VMEM).
    pooled = jnp.sum(x, axis=-1, dtype=jnp.float32) * inv_hw              # (TB, C)

    # linear_layer1 + ReLU.  (PyTorch Linear is x @ W^T + b; W^T is passed in.)
    h = jnp.dot(pooled, w1t_ref[...], preferred_element_type=jnp.float32) + b1_ref[...]
    h = jnp.maximum(h, 0.0)

    # linear_layer2 + sigmoid.
    g = jnp.dot(h, w2t_ref[...], preferred_element_type=jnp.float32) + b2_ref[...]
    g = jax.nn.sigmoid(g)                                                 # (TB, C) f32

    # x * weights.view(B, C, 1, 1): channel-wise gate, stored in the input dtype
    # (lane-dense store along HW).
    o_ref[...] = (x * g.astype(x.dtype)[:, :, None]).astype(o_ref.dtype)


def _jnp_fallback(x_nchw, w1, b1, w2, b2):
    pooled = jnp.mean(x_nchw.astype(jnp.float32), axis=(2, 3))
    h = jax.nn.relu(pooled @ jnp.asarray(w1, jnp.float32).T + jnp.asarray(b1, jnp.float32))
    g = jax.nn.sigmoid(h @ jnp.asarray(w2, jnp.float32).T + jnp.asarray(b2, jnp.float32))
    return x_nchw * g.astype(x_nchw.dtype)[:, :, None, None]


def _attention_gate_impl(x_nchw, w1, b1, w2, b2, *, batch_tile, donate_x):
    x_nchw = jnp.asarray(x_nchw)
    if x_nchw.dtype not in (jnp.float32, jnp.bfloat16):
        x_nchw = x_nchw.astype(jnp.float32)
    dtype = x_nchw.dtype
    B, C, H, W = x_nchw.shape
    HW = H * W
    x = x_nchw.reshape(B, C, HW)         # trailing-dim collapse: bitcast under jit

    # ---- VMEM budget & batch-tile sizing (per TPU generation) ----------------
    itemsize = dtype.itemsize
    sublane = 8 * (4 // itemsize)                         # 8 rows f32, 16 rows bf16
    slab = _round_up(C, sublane) * _round_up(HW, 128) * itemsize   # VMEM / batch elt
    param_bytes = (2 * C * C + 2 * C) * 4 * 2

    vmem_cap = _vmem_capacity_bytes()
    budget = int(0.75 * vmem_cap) - param_bytes - (2 << 20)   # 2 in + 2 out buffers

    if budget < 4 * slab:
        # TODO(synk): two-pass pool-then-rescale Pallas kernel (spatial-chunk
        # reduction grid + rescale pass) for C*HW slabs that exceed VMEM (mostly
        # v7x's 64 MiB); plain-XLA fallback for now.
        return _jnp_fallback(x_nchw, w1, b1, w2, b2)

    max_tb = max(1, budget // (4 * slab))
    prefer_even = _num_tensorcores() >= 2
    if batch_tile is None:
        tb = _choose_batch_tile(B, max_tb, prefer_even)
    else:
        # Clamp a user tile to the VMEM budget and snap down to a divisor of B so
        # no batch padding (and no output slice) is ever needed.
        limit = max(1, min(int(batch_tile), max_tb, B))
        tb = (_divisors_up_to(B, limit) or [1])[-1]
    n_blocks = B // tb

    vmem_limit = int(min(vmem_cap,
                         max(4 * tb * slab + param_bytes + (8 << 20), 16 << 20)))

    # PyTorch Linear computes x @ W^T + b -> pass transposed weights (plain JAX glue).
    w1t = jnp.asarray(w1, jnp.float32).T
    w2t = jnp.asarray(w2, jnp.float32).T
    b1r = jnp.asarray(b1, jnp.float32).reshape(1, C)
    b2r = jnp.asarray(b2, jnp.float32).reshape(1, C)

    kernel = functools.partial(_attention_gate_kernel, inv_hw=1.0 / HW)

    x_bytes = B * C * HW * itemsize
    cost = pl.CostEstimate(
        flops=2 * B * C * HW + 4 * B * C * C,             # pool + rescale + 2 FCs
        transcendentals=B * C,                            # sigmoid
        bytes_accessed=2 * x_bytes + (2 * C * C + 2 * C) * 4,
    )

    # TODO(synk): for C % 8 != 0, pack (B*C) rows onto the sublane axis ((B*C, HW)
    # blocks) to avoid sublane-padded vregs; it only affects VMEM/VPU occupancy,
    # not HBM bytes, for this HBM-bound kernel.
    out = pl.pallas_call(
        kernel,
        out_shape=jax.ShapeDtypeStruct((B, C, HW), dtype),
        grid_spec=pltpu.PrefetchScalarGridSpec(
            num_scalar_prefetch=0,
            grid=(n_blocks,),
            in_specs=[
                # Full-extent C / HW block dims: no spatial pad, no output slice.
                pl.BlockSpec((tb, C, HW), lambda i: (i, 0, 0)),
                # Weights/biases: constant block index -> fetched once and kept
                # VMEM-resident across grid steps (no per-step re-DMA).
                pl.BlockSpec((C, C), lambda i: (0, 0)),
                pl.BlockSpec((1, C), lambda i: (0, 0)),
                pl.BlockSpec((C, C), lambda i: (0, 0)),
                pl.BlockSpec((1, C), lambda i: (0, 0)),
            ],
            out_specs=pl.BlockSpec((tb, C, HW), lambda i: (i, 0, 0)),
        ),
        compiler_params=pltpu.CompilerParams(
            dimension_semantics=("parallel",),
            vmem_limit_bytes=vmem_limit,
        ),
        cost_estimate=cost,
        input_output_aliases=({0: 0} if donate_x else {}),
    )(x, w1t, b1r, w2t, b2r)

    return out.reshape(B, C, H, W)


_attention_gate_jit = jax.jit(_attention_gate_impl,
                              static_argnames=("batch_tile", "donate_x"))


def attention_gate(x_nchw, w1, b1, w2, b2, *, batch_tile=None, donate_x=False):
    """AttentionGate forward.  x: (B,C,H,W) f32/bf16; w1,w2: (C,C); b1,b2: (C,)."""
    return _attention_gate_jit(x_nchw, w1, b1, w2, b2,
                               batch_tile=batch_tile, donate_x=donate_x)


def _reference(x_nchw, w1, b1, w2, b2):
    pooled = jnp.mean(x_nchw.astype(jnp.float32), axis=(2, 3))
    h = jax.nn.relu(pooled @ w1.T + b1)
    g = jax.nn.sigmoid(h @ w2.T + b2)
    return x_nchw.astype(jnp.float32) * g[:, :, None, None]


if __name__ == "__main__":
    B, C, H, W = 2, 4, 16, 16
    key = jax.random.PRNGKey(0)
    kx, k1, k2, k3, k4 = jax.random.split(key, 5)

    x = jax.random.normal(kx, (B, C, H, W), dtype=jnp.float32)
    # Deterministic synthetic parameters (nn.Linear(channels, channels) shapes).
    w1 = jax.random.normal(k1, (C, C), dtype=jnp.float32) * 0.2
    b1 = jax.random.normal(k2, (C,), dtype=jnp.float32) * 0.1
    w2 = jax.random.normal(k3, (C, C), dtype=jnp.float32) * 0.2
    b2 = jax.random.normal(k4, (C,), dtype=jnp.float32) * 0.1

    out = attention_gate(x, w1, b1, w2, b2)
    jax.block_until_ready(out)
    ref = _reference(x, w1, b1, w2, b2)
    assert out.shape == (B, C, H, W) and out.dtype == jnp.float32
    assert jnp.allclose(out, ref, atol=1e-5, rtol=1e-5)

    # Ragged spatial extent (HW not a multiple of 128) and odd batch: exercises
    # the no-pad / masked-store path with zero wrapper-side copies.
    x2 = jax.random.normal(kx, (3, C, 5, 7), dtype=jnp.float32)
    out2 = attention_gate(x2, w1, b1, w2, b2)
    jax.block_until_ready(out2)
    assert jnp.allclose(out2, _reference(x2, w1, b1, w2, b2), atol=1e-5, rtol=1e-5)

    # Native bf16 I/O path (math still f32 in-kernel).
    xb = x.astype(jnp.bfloat16)
    outb = attention_gate(xb, w1, b1, w2, b2)
    jax.block_until_ready(outb)
    assert outb.dtype == jnp.bfloat16
    assert jnp.allclose(outb.astype(jnp.float32), _reference(xb, w1, b1, w2, b2),
                        atol=2e-2, rtol=2e-2)

    print("KERNEL_OK")
</pallas_src>

<mosaic_0001>
module attributes {stable_mosaic.version = 11 : i64} {
  func.func @_attention_gate_kernel(%arg0: i32, %arg1: memref<2x4x256xf32, #tpu.memory_space<vmem>>, %arg2: memref<4x4xf32, #tpu.memory_space<vmem>>, %arg3: memref<1x4xf32, #tpu.memory_space<vmem>>, %arg4: memref<4x4xf32, #tpu.memory_space<vmem>>, %arg5: memref<1x4xf32, #tpu.memory_space<vmem>>, %arg6: memref<2x4x256xf32, #tpu.memory_space<vmem>>) attributes {dimension_semantics = [#tpu.dimension_semantics<parallel>], iteration_bounds = array<i64: 1>, scalar_prefetch = 0 : i64, scratch_operands = 0 : i64, tpu.core_type = #tpu.core_type<tc>, window_params = [{transform_indices = @transform_0, window_bounds = array<i64: 2, 4, 256>}, {pipeline_mode = #tpu.pipeline_mode<synchronous>, transform_indices = @transform_1, window_bounds = array<i64: 4, 4>}, {pipeline_mode = #tpu.pipeline_mode<synchronous>, transform_indices = @transform_2, window_bounds = array<i64: 1, 4>}, {pipeline_mode = #tpu.pipeline_mode<synchronous>, transform_indices = @transform_3, window_bounds = array<i64: 4, 4>}, {pipeline_mode = #tpu.pipeline_mode<synchronous>, transform_indices = @transform_4, window_bounds = array<i64: 1, 4>}, {transform_indices = @transform_5, window_bounds = array<i64: 2, 4, 256>}]} {
    %c0 = arith.constant 0 : index
    %c0_0 = arith.constant 0 : index
    %c0_1 = arith.constant 0 : index
    %0 = vector.load %arg1[%c0, %c0_0, %c0_1] : memref<2x4x256xf32, #tpu.memory_space<vmem>>, vector<2x4x256xf32>
    %cst = arith.constant dense<0.000000e+00> : vector<2x4xf32>
    %1 = vector.multi_reduction <add>, %0, %cst [2] : vector<2x4x256xf32> to vector<2x4xf32>
    %cst_2 = arith.constant 3.906250e-03 : f32
    %2 = vector.broadcast %cst_2 : f32 to vector<2x4xf32>
    %3 = arith.mulf %1, %2 : vector<2x4xf32>
    %c0_3 = arith.constant 0 : index
    %c0_4 = arith.constant 0 : index
    %4 = vector.load %arg2[%c0_3, %c0_4] : memref<4x4xf32, #tpu.memory_space<vmem>>, vector<4x4xf32>
    %cst_5 = arith.constant dense<0.000000e+00> : vector<2x4xf32>
    %5 = tpu.matmul %3, %4, %cst_5 {dimension_numbers = #tpu.dot_dimension_numbers<[1], [0], [0], [1], [0, 0, 1, 1], [], []>} : vector<2x4xf32>, vector<4x4xf32>, vector<2x4xf32> -> vector<2x4xf32>
    %c0_6 = arith.constant 0 : index
    %c0_7 = arith.constant 0 : index
    %6 = vector.load %arg3[%c0_6, %c0_7] : memref<1x4xf32, #tpu.memory_space<vmem>>, vector<1x4xf32>
    %7 = vector.broadcast %6 : vector<1x4xf32> to vector<2x4xf32>
    %8 = arith.addf %5, %7 : vector<2x4xf32>
    %cst_8 = arith.constant 0.000000e+00 : f32
    %9 = vector.broadcast %cst_8 : f32 to vector<2x4xf32>
    %10 = arith.maximumf %8, %9 : vector<2x4xf32>
    %c0_9 = arith.constant 0 : index
    %c0_10 = arith.constant 0 : index
    %11 = vector.load %arg4[%c0_9, %c0_10] : memref<4x4xf32, #tpu.memory_space<vmem>>, vector<4x4xf32>
    %cst_11 = arith.constant dense<0.000000e+00> : vector<2x4xf32>
    %12 = tpu.matmul %10, %11, %cst_11 {dimension_numbers = #tpu.dot_dimension_numbers<[1], [0], [0], [1], [0, 0, 1, 1], [], []>} : vector<2x4xf32>, vector<4x4xf32>, vector<2x4xf32> -> vector<2x4xf32>
    %c0_12 = arith.constant 0 : index
    %c0_13 = arith.constant 0 : index
    %13 = vector.load %arg5[%c0_12, %c0_13] : memref<1x4xf32, #tpu.memory_space<vmem>>, vector<1x4xf32>
    %14 = vector.broadcast %13 : vector<1x4xf32> to vector<2x4xf32>
    %15 = arith.addf %12, %14 : vector<2x4xf32>
    %16 = arith.negf %15 : vector<2x4xf32>
    %17 = math.exp %16 : vector<2x4xf32>
    %cst_14 = arith.constant 1.000000e+00 : f32
    %18 = vector.broadcast %cst_14 : f32 to vector<2x4xf32>
    %19 = arith.addf %18, %17 : vector<2x4xf32>
    %20 = arith.divf %18, %19 : vector<2x4xf32>
    %21 = vector.shape_cast %20 : vector<2x4xf32> to vector<2x4x1xf32>
    %22 = vector.broadcast %21 : vector<2x4x1xf32> to vector<2x4x256xf32>
    %23 = arith.mulf %0, %22 : vector<2x4x256xf32>
    %c0_15 = arith.constant 0 : index
    %c0_16 = arith.constant 0 : index
    %c0_17 = arith.constant 0 : index
    %24 = vector.load %arg6[%c0_15, %c0_16, %c0_17] : memref<2x4x256xf32, #tpu.memory_space<vmem>>, vector<2x4x256xf32>
    tpu.vector_store %arg6[%c0_15, %c0_16, %c0_17], %23 {strides = array<i32>} : memref<2x4x256xf32, #tpu.memory_space<vmem>>, vector<2x4x256xf32>,
    return
  }
  func.func @transform_0(%arg0: i32) -> (i32, i32, i32) {
    %c0_i32 = arith.constant 0 : i32
    %c0_i32_0 = arith.constant 0 : i32
    %c0_i32_1 = arith.constant 0 : i32
    return %arg0, %c0_i32, %c0_i32_0 : i32, i32, i32
  }
  func.func @transform_1(%arg0: i32) -> (i32, i32) {
    %c0_i32 = arith.constant 0 : i32
    %c0_i32_0 = arith.constant 0 : i32
    %c0_i32_1 = arith.constant 0 : i32
    return %c0_i32, %c0_i32_0 : i32, i32
  }
  func.func @transform_2(%arg0: i32) -> (i32, i32) {
    %c0_i32 = arith.constant 0 : i32
    %c0_i32_0 = arith.constant 0 : i32
    %c0_i32_1 = arith.constant 0 : i32
    return %c0_i32, %c0_i32_0 : i32, i32
  }
  func.func @transform_3(%arg0: i32) -> (i32, i32) {
    %c0_i32 = arith.constant 0 : i32
    %c0_i32_0 = arith.constant 0 : i32
    %c0_i32_1 = arith.constant 0 : i32
    return %c0_i32, %c0_i32_0 : i32, i32
  }
  func.func @transform_4(%arg0: i32) -> (i32, i32) {
    %c0_i32 = arith.constant 0 : i32
    %c0_i32_0 = arith.constant 0 : i32
    %c0_i32_1 = arith.constant 0 : i32
    return %c0_i32, %c0_i32_0 : i32, i32
  }
  func.func @transform_5(%arg0: i32) -> (i32, i32, i32) {
    %c0_i32 = arith.constant 0 : i32
    %c0_i32_0 = arith.constant 0 : i32
    %c0_i32_1 = arith.constant 0 : i32
    return %arg0, %c0_i32, %c0_i32_0 : i32, i32, i32
  }
}

</mosaic_0001>

<bundles_post_ra>
// kernel: _attention_gate_impl.1
= control target key start
LH: loop header
LB: loop body
LE: loop exit
PB: predicated region body
PF: predicated region fallthrough
CT: control target
= control target key end

     0   :  { %vm35_vm0 = vcmask 1043456   ;;  %v55_v14 = vlaneseq  ;;  %vm59_vm1 = vcmask 1041409   ;;  %vm61_vm2 = vcmask 31744   ;;  %s255_s0 = inlined_call_operand.vmem [shape: f32[2,4,256], index: 0, kind: input, shape index: {}]   ;;  %s256_s2 = inlined_call_operand.vmem [shape: f32[1,4], index: 2, kind: input, shape index: {}]   ;;  %s257_s1 = inlined_call_operand.vmem [shape: f32[4,4], index: 1, kind: input, shape index: {}]   ;;  %s258_s4 = inlined_call_operand.vmem [shape: f32[1,4], index: 4, kind: input, shape index: {}]   ;;  %s259_s3 = inlined_call_operand.vmem [shape: f32[4,4], index: 3, kind: input, shape index: {}]   ;;  %s260_s5 = inlined_call_operand.vmem [shape: f32[2,4,256], index: 5, kind: output, shape index: {}]  }
   0x1   :  { %v220_v0 = vld [vmem:[%s255_s0] sm:$0xff]  ;;  %v225_v1 = vld [vmem:[%s255_s0 + $0x8] sm:$0xff]  ;;  %v186_v46 = vmov 839922192  }
   0x2   :  { %24 = vst [vmem:[#allocation1] ss:$2 sm:$0xff] %v220_v0  ;;  %v48_v12 = vld [vmem:[%s257_s1] sm:$0xf]  ;;  %v56_v15 = vand.u32 127, %v55_v14  ;;  %v140_v27 = vshrl.u32 %v55_v14, 7  ;;  %v155_v47 = vunpack.c.l.s4 %v186_v46 }
   0x3   :  { %28 = vst [vmem:[#allocation1 + $0x10] ss:$2 sm:$0xff] %v225_v1  ;;  %172 = vmatpush.msk.msra.mxu0 %vm35_vm0, %v48_v12  ;;  %v88_v22 = vld [vmem:[%s259_s3] sm:$0xf] }
   0x4   :  { %174 = vmatpush.msk.msra.mxu1 %vm35_vm0, %v88_v22  ;;  %v180_v23 = vld [vmem:[%s256_s2] ss:$0 sm:$0xff]  ;;  %178 = vset.pattern.permute.xlu1 %v140_v27  ;;  %v156_v48 = vunpack.c.0.s8 %v155_v47 }
   0x5   :  { %179 = vset.pattern.permute.xlu0 %v140_v27  ;;  %v181_v28 = vld [vmem:[%s258_s4] ss:$0 sm:$0xff] }
   0x9   :  { %v25_v2 = vld.sshfl [vmem:[#allocation1] sm:$0xff pattern:$0x75316420]  ;;  %v26_v3 = vld.sshfl [vmem:[#allocation1 + $0x8] sm:$0xff pattern:$0x75316420] }
   0xa   :  { %v36_v4 = vsel %vm35_vm0, %v25_v2, 0.0  ;;  %v37_v5 = vsel %vm35_vm0, %v26_v3, 0.0  ;;  %v29_v7 = vld.sshfl [vmem:[#allocation1 + $0x10] sm:$0xff pattern:$0x75316420] }
   0xb   :  { %v38_v6 = vadd.f32 %v37_v5, %v36_v4  ;;  %v30_v8 = vld.sshfl [vmem:[#allocation1 + $0x18] sm:$0xff pattern:$0x75316420]  ;;  %v41_v9 = vsel %vm35_vm0, %v29_v7, 0.0 }
   0xc   :  { %v42_v10 = vsel %vm35_vm0, %v30_v8, 0.0 }
   0xd   :  { %39 = vadd.xlane.f32.xlu0 %v38_v6  ;;  %v43_v11 = vadd.f32 %v42_v10, %v41_v9 }
  0x15   :  { %44 = vadd.xlane.f32.xlu0 %v43_v11 }
  0x80   :  { %v40_v13 = vpop.xlane.xlu0 %39 }
  0x81   :  { %v46_v16 = vmul.f32 0.00390625, %v40_v13 }
  0x83   :  { %v57_v19 = vperm.slane %v46_v16, %v56_v15 }
  0x88   :  { %v45_v17 = vpop.xlane.xlu0 %44 }
  0x89   :  { %v47_v18 = vmul.f32 0.00390625, %v45_v17 }
  0x8b   :  { %v58_v20 = vperm.slane %v47_v18, %v56_v15 }
  0x8d   :  { %v60_v21 = vsel %vm59_vm1, %v58_v20, %v57_v19 }
  0x8e   :  { %173 = vmatmul.msk.f32.vlgmr.msra.gmra.mxu0 %vm61_vm2, %v60_v21 }
 0x10b   :  { %v84_v24 = vpop.f32.mrf.mxu0 }
 0x10c   :  { %v85_v25 = vadd.f32 %v180_v23, %v84_v24 }
 0x10e   :  { %v87_v26 = vmax.f32 %v85_v25, 0.0 }
 0x110   :  { %175 = vmatmul.msk.f32.vlgmr.msra.gmra.mxu1 %vm61_vm2, %v87_v26 }
 0x18d   :  { %v116_v29 = vpop.f32.mrf.mxu1 }
 0x18e   :  { %v117_v30 = vadd.f32 %v181_v28, %v116_v29 }
 0x190   :  { %v176_v31 = vmul.f32 -1.442695, %v117_v30 }
 0x192   :  { %182 = vpow2.f32 %v176_v31 }
 0x198   :  { %v183_v32 = vpop.eup %182 }
 0x199   :  { %v122_v33 = vadd.f32 1.0, %v183_v32 }
 0x19b   :  { %184 = vrcp.f32 %v122_v33  ;;  %v134_v37 = vand.u32 2147483648, %v122_v33  ;;  %v132_v39 = vand.u32 2147483647, %v122_v33  ;;  %vm128_vm4 = vweird.f32 %v122_v33 }
 0x19d   :  { %v135_v41 = vor.u32 1.1754944e-38, %v134_v37  ;;  %vm133_vm6 = vcmp.eq.f32.partialorder %v132_v39, 8.507059e+37 }
 0x1a1   :  { %v185_v34 = vpop.eup %184 }
 0x1a2   :  { %v124_v35 = vmul.f32 %v185_v34, %v122_v33  ;;  %vm129_vm3 = vweird.f32 %v185_v34 }
 0x1a3   :  { %vm130_vm5 = vmor %vm128_vm4, %vm129_vm3 }
 0x1a4   :  { %v125_v36 = vsub.f32 1.0, %v124_v35 }
 0x1a6   :  { %v126_v38 = vmul.f32 %v185_v34, %v125_v36 }
 0x1a8   :  { %v127_v40 = vadd.f32 %v185_v34, %v126_v38 }
 0x1aa   :  { %v131_v42 = vsel %vm130_vm5, %v185_v34, %v127_v40 }
 0x1ab   :  { %v136_v43 = vsel %vm133_vm6, %v135_v41, %v131_v42 }
 0x1ac   :  { %v138_v44 = vperm.slane %v136_v43, 0  ;;  %v145_v45 = vperm.slane %v136_v43, 1 }
 0x1ae   :  { %143 = vperm.xlu1 %178, %v138_v44  }
 0x1b6   :  { %150 = vperm.xlu1 %178, %v145_v45  }
 0x220   :  { %v144_v49 = vpop.permute.xlu1 %143 }
 0x221   :  { %v157_v50 = vperm.slane %v144_v49, %v156_v48 }
 0x223   :  { %v164_v51 = vmul.f32 %v157_v50, %v220_v0 }
 0x225   :  { %166 = vst [vmem:[%s260_s5] sm:$0xff] %v164_v51 }
 0x228   :  { %v151_v52 = vpop.permute.xlu1 %150 }
 0x229   :  { %v161_v53 = vperm.slane %v151_v52, %v156_v48 }
 0x22b   :  { %v165_v54 = vmul.f32 %v161_v53, %v225_v1 }
 0x22d   :  { %167 = vst [vmem:[%s260_s5 + $0x8] sm:$0xff] %v165_v54 }

</bundles_post_ra>
